<compile_context>
chip_gen: v7x
topology: tpu7x:2x2x1
jax: 0.10.0
libtpu: 0.0.40
codegen_flags: <defaults>
</compile_context>

<pallas_src>
import functools
import math

import jax
import jax.numpy as jnp
from jax.experimental import pallas as pl
from jax.experimental.pallas import tpu as pltpu

FLAG_SIZE = 4
LANES = 128
_STREAM_VMEM_BUDGET = 24 << 20          # budget for double-buffered x + out tiles
_RESIDENT_SINGLE_BUF_BYTES = 2 << 20    # single-buffer resident weight above this
_MEGACORE_MIN_ROWS = 512                # split grid into >= 2 steps above this


def _round_up(x, mult):
    return ((x + mult - 1) // mult) * mult


def _linear_message_kernel(x_ref, w_ref, b_ref, o_ref):
    # x_ref: (tm, width)    activations, p rows packed per lane-dense row
    # w_ref: (width, width) block-diagonal weight, resident across the grid
    # b_ref: (1, width)     f32 effective bias (flag term already folded in)
    # o_ref: (tm, width)
    acc = jnp.dot(x_ref[...], w_ref[...], preferred_element_type=jnp.float32)
    o_ref[...] = (acc + b_ref[...]).astype(o_ref.dtype)


@functools.partial(jax.jit, static_argnames=("block_rows", "use_bf16", "out_dtype"))
def linear_message(message, message_flag, weight, bias, *, block_rows=4096,
                   use_bf16=False, out_dtype=None):
    """Pallas LinearMessage forward.

    message:      (..., hidden)
    message_flag: (FLAG_SIZE,)
    weight:       (hidden, hidden + FLAG_SIZE)   -- torch nn.Linear layout
    bias:         (hidden,)
    use_bf16:     stream activations/weight as bf16 (f32 MXU accumulate). A win on
                  every generation, including v5e (largest relative win there).
    out_dtype:    output dtype; pass jnp.bfloat16 to also halve the store stream.
    """
    hidden = message.shape[-1]
    lead = message.shape[:-1]
    m = math.prod(lead) if lead else 1
    out_dt = jnp.dtype(message.dtype) if out_dtype is None else jnp.dtype(out_dtype)

    # ---- parameter glue (tiny, outside the hot path) ---------------------------
    # Fold the constant flag contribution into the bias:
    #   y = [x, flag] @ W.T + b = x @ W[:, :h].T + (b + W[:, h:] @ flag)
    w_main_t = weight[:, :hidden].T                                    # (h_in, h_out)
    eff_bias = (bias.astype(jnp.float32)
                + weight[:, hidden:].astype(jnp.float32)
                @ message_flag.astype(jnp.float32))                    # (h,) f32

    x = message.reshape(m, hidden)

    # ---- compute dtype (x and w always match; bias add stays f32) --------------
    # NOTE: keeping the (resident, bandwidth-free) weight in f32 and upcasting x
    # in-kernel would tighten bf16 error further; matched bf16 keeps the MXU on
    # its native single-pass path and is accurate enough for a message mix.
    cdt = jnp.dtype(jnp.bfloat16) if use_bf16 else jnp.dtype(message.dtype)
    in_bytes = cdt.itemsize
    out_bytes = out_dt.itemsize
    sub = 16 if cdt == jnp.dtype(jnp.bfloat16) else 8    # sublane multiple

    # ---- feature padding so the packed width is always lane-dense --------------
    if hidden <= LANES:
        hp = pl.next_power_of_2(hidden)                  # divides 128
        p = LANES // hp
    else:
        hp = _round_up(hidden, LANES)
        p = 1
    if hp != hidden:
        x = jnp.pad(x, ((0, 0), (0, hp - hidden)))
        w_main_t = jnp.pad(w_main_t, ((0, hp - hidden), (0, hp - hidden)))
        eff_bias = jnp.pad(eff_bias, (0, hp - hidden))

    # ---- row padding + lane-dense packing ---------------------------------------
    # Pack p rows into one 128-lane row (free row-major reshape) and use a
    # block-diagonal weight so loads AND stores are unmasked full-lane accesses.
    row_mult = p * sub
    m_pad = _round_up(m, row_mult)
    if m_pad != m:
        x = jnp.pad(x, ((0, m_pad - m), (0, 0)))
    rows, width = m_pad // p, p * hp
    x = x.reshape(rows, width)

    if p > 1:
        w = jnp.kron(jnp.eye(p, dtype=w_main_t.dtype), w_main_t)      # block-diag
        b = jnp.tile(eff_bias, p).reshape(1, width)
    else:
        w = w_main_t
        b = eff_bias.reshape(1, width)

    x = x.astype(cdt)
    w = w.astype(cdt)

    # ---- tiling ------------------------------------------------------------------
    # TODO(synk): for very large hidden (resident weight approaching v7x's 64 MiB
    # VMEM) add N/K grid axes with an f32 VMEM accumulator instead of keeping the
    # whole weight resident.
    per_row_stream = 2 * width * (in_bytes + out_bytes)        # dbl-buffered x + out
    tm_cap = max(sub, (_STREAM_VMEM_BUDGET // per_row_stream) // sub * sub)
    block_rows_eff = max(sub, (block_rows // sub) * sub)

    if rows > block_rows_eff:
        tm = block_rows_eff
    elif rows >= _MEGACORE_MIN_ROWS:
        # >= 2 grid steps so v7x's two TensorCores both get work from the single
        # "parallel" axis; one extra ~0.35us step is noise on 1-TC chips here.
        tm = _round_up(pl.cdiv(rows, 2), sub)
    else:
        tm = rows
    tm = min(tm, tm_cap)
    grid = (pl.cdiv(rows, tm),)

    # ---- specs / compiler hints ---------------------------------------------------
    w_resident_bytes = width * width * in_bytes
    if w_resident_bytes > _RESIDENT_SINGLE_BUF_BYTES:
        # Constant index_map -> DMA'd once anyway; single-buffer to save VMEM (v7x).
        w_spec = pl.BlockSpec((width, width), lambda i: (0, 0),
                              pipeline_mode=pl.Buffered(1))
        n_w_bufs = 1
    else:
        w_spec = pl.BlockSpec((width, width), lambda i: (0, 0))
        n_w_bufs = 2

    vmem_need = (2 * tm * width * (in_bytes + out_bytes)
                 + n_w_bufs * w_resident_bytes + 2 * width * 4)
    vmem_limit = int(min(max(vmem_need + (8 << 20), 32 << 20), 128 << 20))

    cost = pl.CostEstimate(
        flops=2 * rows * width * width,
        transcendentals=0,
        bytes_accessed=(rows * width * (in_bytes + out_bytes)
                        + width * width * in_bytes + width * 4),
    )

    out = pl.pallas_call(
        _linear_message_kernel,
        out_shape=jax.ShapeDtypeStruct((rows, width), out_dt),
        grid_spec=pltpu.PrefetchScalarGridSpec(
            num_scalar_prefetch=0,
            grid=grid,
            in_specs=[
                pl.BlockSpec((tm, width), lambda i: (i, 0)),
                w_spec,
                pl.BlockSpec((1, width), lambda i: (0, 0)),
            ],
            out_specs=pl.BlockSpec((tm, width), lambda i: (i, 0)),
        ),
        compiler_params=pltpu.CompilerParams(
            dimension_semantics=("parallel",),
            vmem_limit_bytes=vmem_limit),
        cost_estimate=cost,
    )(x, w, b)

    # Unpack (free row-major reshape), drop row/feature padding.
    out = out.reshape(m_pad, hp)[:m, :hidden]
    return out.reshape(*lead, hidden)


def _reference(message, message_flag, weight, bias):
    lead = message.shape[:-1]
    flag_exp = jnp.broadcast_to(message_flag, (*lead, FLAG_SIZE)).astype(jnp.float32)
    xcat = jnp.concatenate([message.astype(jnp.float32), flag_exp], axis=-1)
    return xcat @ weight.astype(jnp.float32).T + bias.astype(jnp.float32)


if __name__ == "__main__":
    key = jax.random.PRNGKey(0)
    (k_msg, k_flag, k_w, k_b,
     k_msg2, k_flag2, k_w2, k_b2) = jax.random.split(key, 8)

    # Case 1: batch=2, seq=8, hidden=32 (lane-dense packing p = 128/32 = 4).
    batch, seq, hidden = 2, 8, 32
    message = jax.random.normal(k_msg, (batch, seq, hidden), dtype=jnp.float32)
    # torch init has flag = zeros; use small random values so the fold is exercised.
    message_flag = 0.1 * jax.random.normal(k_flag, (FLAG_SIZE,), dtype=jnp.float32)
    weight = 0.1 * jax.random.normal(k_w, (hidden, hidden + FLAG_SIZE), dtype=jnp.float32)
    bias = 0.1 * jax.random.normal(k_b, (hidden,), dtype=jnp.float32)

    ref = _reference(message, message_flag, weight, bias)

    out = jax.block_until_ready(linear_message(message, message_flag, weight, bias))
    assert out.shape == (batch, seq, hidden), out.shape
    assert jnp.allclose(out, ref, atol=1e-5, rtol=1e-5), \
        float(jnp.max(jnp.abs(out - ref)))

    # bf16 activation/weight stream (win on v5e/v6e/v7x), f32 output.
    out_bf16 = jax.block_until_ready(
        linear_message(message, message_flag, weight, bias, use_bf16=True))
    assert out_bf16.shape == (batch, seq, hidden)
    assert jnp.allclose(out_bf16, ref, atol=5e-2, rtol=5e-2), \
        float(jnp.max(jnp.abs(out_bf16 - ref)))

    # bf16 output as well (halves the store stream; kernel is HBM-bound).
    out_bf16o = jax.block_until_ready(
        linear_message(message, message_flag, weight, bias,
                       use_bf16=True, out_dtype=jnp.bfloat16))
    assert out_bf16o.dtype == jnp.bfloat16
    assert jnp.allclose(out_bf16o.astype(jnp.float32), ref, atol=5e-2, rtol=5e-2), \
        float(jnp.max(jnp.abs(out_bf16o.astype(jnp.float32) - ref)))

    # Case 2: hidden=48 (feature-pads to 64, p=2) with a ragged row count
    # (exercises the row/feature zero-padding so the lane-dense path is always taken).
    b2, s2, h2 = 3, 5, 48
    message2 = jax.random.normal(k_msg2, (b2, s2, h2), dtype=jnp.float32)
    flag2 = 0.1 * jax.random.normal(k_flag2, (FLAG_SIZE,), dtype=jnp.float32)
    weight2 = 0.1 * jax.random.normal(k_w2, (h2, h2 + FLAG_SIZE), dtype=jnp.float32)
    bias2 = 0.1 * jax.random.normal(k_b2, (h2,), dtype=jnp.float32)
    ref2 = _reference(message2, flag2, weight2, bias2)
    out2 = jax.block_until_ready(linear_message(message2, flag2, weight2, bias2))
    assert out2.shape == (b2, s2, h2), out2.shape
    assert jnp.allclose(out2, ref2, atol=1e-4, rtol=1e-4), \
        float(jnp.max(jnp.abs(out2 - ref2)))

    print("KERNEL_OK")
</pallas_src>

<mosaic_0001>
module attributes {stable_mosaic.version = 11 : i64} {
  func.func @_linear_message_kernel(%arg0: i32, %arg1: memref<8x128xf32, #tpu.memory_space<vmem>>, %arg2: memref<128x128xf32, #tpu.memory_space<vmem>>, %arg3: memref<1x128xf32, #tpu.memory_space<vmem>>, %arg4: memref<8x128xf32, #tpu.memory_space<vmem>>) attributes {dimension_semantics = [#tpu.dimension_semantics<parallel>], iteration_bounds = array<i64: 1>, scalar_prefetch = 0 : i64, scratch_operands = 0 : i64, tpu.core_type = #tpu.core_type<tc>, window_params = [{transform_indices = @transform_0, window_bounds = array<i64: 8, 128>}, {pipeline_mode = #tpu.pipeline_mode<synchronous>, transform_indices = @transform_1, window_bounds = array<i64: 128, 128>}, {pipeline_mode = #tpu.pipeline_mode<synchronous>, transform_indices = @transform_2, window_bounds = array<i64: 1, 128>}, {transform_indices = @transform_3, window_bounds = array<i64: 8, 128>}]} {
    %c0 = arith.constant 0 : index
    %c0_0 = arith.constant 0 : index
    %0 = vector.load %arg1[%c0, %c0_0] : memref<8x128xf32, #tpu.memory_space<vmem>>, vector<8x128xf32>
    %c0_1 = arith.constant 0 : index
    %c0_2 = arith.constant 0 : index
    %1 = vector.load %arg2[%c0_1, %c0_2] : memref<128x128xf32, #tpu.memory_space<vmem>>, vector<128x128xf32>
    %cst = arith.constant dense<0.000000e+00> : vector<8x128xf32>
    %2 = tpu.matmul %0, %1, %cst {dimension_numbers = #tpu.dot_dimension_numbers<[1], [0], [0], [1], [0, 0, 1, 1], [], []>} : vector<8x128xf32>, vector<128x128xf32>, vector<8x128xf32> -> vector<8x128xf32>
    %c0_3 = arith.constant 0 : index
    %c0_4 = arith.constant 0 : index
    %3 = vector.load %arg3[%c0_3, %c0_4] : memref<1x128xf32, #tpu.memory_space<vmem>>, vector<1x128xf32>
    %4 = vector.broadcast %3 : vector<1x128xf32> to vector<8x128xf32>
    %5 = arith.addf %2, %4 : vector<8x128xf32>
    %c0_5 = arith.constant 0 : index
    %c0_6 = arith.constant 0 : index
    %6 = vector.load %arg4[%c0_5, %c0_6] : memref<8x128xf32, #tpu.memory_space<vmem>>, vector<8x128xf32>
    tpu.vector_store %arg4[%c0_5, %c0_6], %5 {strides = array<i32>} : memref<8x128xf32, #tpu.memory_space<vmem>>, vector<8x128xf32>,
    return
  }
  func.func @transform_0(%arg0: i32) -> (i32, i32) {
    %c0_i32 = arith.constant 0 : i32
    %c0_i32_0 = arith.constant 0 : i32
    return %arg0, %c0_i32 : i32, i32
  }
  func.func @transform_1(%arg0: i32) -> (i32, i32) {
    %c0_i32 = arith.constant 0 : i32
    %c0_i32_0 = arith.constant 0 : i32
    %c0_i32_1 = arith.constant 0 : i32
    return %c0_i32, %c0_i32_0 : i32, i32
  }
  func.func @transform_2(%arg0: i32) -> (i32, i32) {
    %c0_i32 = arith.constant 0 : i32
    %c0_i32_0 = arith.constant 0 : i32
    %c0_i32_1 = arith.constant 0 : i32
    return %c0_i32, %c0_i32_0 : i32, i32
  }
  func.func @transform_3(%arg0: i32) -> (i32, i32) {
    %c0_i32 = arith.constant 0 : i32
    %c0_i32_0 = arith.constant 0 : i32
    return %arg0, %c0_i32 : i32, i32
  }
}

</mosaic_0001>

<bundles_post_ra>
// kernel: tile.8
= control target key start
LH: loop header
LB: loop body
LE: loop exit
PB: predicated region body
PF: predicated region fallthrough
CT: control target
= control target key end

     0   :  { %s22_s0 = inlined_call_operand.vmem [shape: f32[32], index: 0, kind: input, shape index: {}]   ;;  %s23_s1 = inlined_call_operand.vmem [shape: f32[4,32], index: 1, kind: output, shape index: {}]  }
   0x1   :  { %v4_v0 = vld [vmem:[%s22_s0] ss:$0 sm:$0xff] }
   0x2   :  { %5 = vst [vmem:[%s23_s1] sm:$0xf] %v4_v0 }

// kernel: tile.9
= control target key start
LH: loop header
LB: loop body
LE: loop exit
PB: predicated region body
PF: predicated region fallthrough
CT: control target
= control target key end

     0   :  { %vm7_vm0 = vcmask 261120   ;;  %s37_s8 = smov 32   ;;  %s38_s9 = smov 64   ;;  %vm13_vm1 = vcmask 1048320   ;;  %vm19_vm2 = vcmask 785920   ;;  %vm25_vm3 = vcmask 523520   ;;  %s55_s0 = inlined_call_operand.vmem [shape: f32[4,32], index: 0, kind: input, shape index: {}]   ;;  %s56_s1 = inlined_call_operand.vmem [shape: f32[1,128], index: 1, kind: output, shape index: {}]  }
   0x1   :  { %v4_v0 = vld [vmem:[%s55_s0] sm:$0xf]  ;;  %s36_s0 = smov 96  }
   0x2   :  { %5 = vst [vmem:[#allocation1] sm:$0xf] %v4_v0 }
   0x9   :  { %v10_v1 = vld [vmem:[#allocation1 + $0x3] sm:$0x1]   ;;  %v22_v2 = vld [vmem:[#allocation1 + $0x1] sm:$0x1]   ;;  %v6_v3 = vld [vmem:[#allocation1] sm:$0x1]  }
   0xa   :  { %11 = vrot.lane.b32.xlu0 %v10_v1, %s36_s0  ;;  %23 = vrot.lane.b32.xlu1 %v22_v2, %s37_s8  ;;  %v16_v4 = vld [vmem:[#allocation1 + $0x2] sm:$0x1]   ;;  %8 = vst.msk [vmem:[#allocation0] sm:$0x1] %vm7_vm0, %v6_v3  }
   0xe   :  { %17 = vrot.lane.b32.xlu0 %v16_v4, %s38_s9 }
  0x7c   :  { %v12_v5 = vpop.permute.xlu0 %11   ;;  %v24_v6 = vpop.permute.xlu1 %23  }
  0x7d   :  { %14 = vst.msk [vmem:[#allocation0] sm:$0x1] %vm13_vm1, %v12_v5  }
  0x80   :  { %v18_v7 = vpop.permute.xlu0 %17  }
  0x81   :  { %20 = vst.msk [vmem:[#allocation0] sm:$0x1] %vm19_vm2, %v18_v7  }
  0x82   :  { %26 = vst.msk [vmem:[#allocation0] sm:$0x1] %vm25_vm3, %v24_v6  }
  0x89   :  { %v30_v8 = vld [vmem:[#allocation0] sm:$0x1] }
  0x8a   :  { %32 = vst [vmem:[%s56_s1] sm:$0x1] %v30_v8 }

// kernel: linear_message.1
= control target key start
LH: loop header
LB: loop body
LE: loop exit
PB: predicated region body
PF: predicated region fallthrough
CT: control target
= control target key end

     0   :  { %v193_v0 = vmov 0.0|0.0   ;;  %vm194_vm0 = vmmov 0   ;;  %v195_v4 = vmov 0.0   ;;  %s273_s1 = inlined_call_operand.vmem [shape: f32[128,128], index: 1, kind: input, shape index: {}]   ;;  %s274_s0 = inlined_call_operand.vmem [shape: f32[8,128], index: 0, kind: input, shape index: {}]   ;;  %s275_s2 = inlined_call_operand.vmem [shape: f32[1,128], index: 2, kind: input, shape index: {}]   ;;  %s276_s3 = inlined_call_operand.vmem [shape: f32[8,128], index: 3, kind: output, shape index: {}]  }
   0x1   :  { %166 = vmatprep.subr.bf16.mxu0 %v193_v0  ;;  %v15_v1 = vld [vmem:[%s273_s1] sm:$0xff]  ;;  %v16_v2 = vld [vmem:[%s273_s1 + $0x8] sm:$0xff]  ;;  %v17_v3 = vld [vmem:[%s273_s1 + $0x10] sm:$0xff]  ;;  %163 = vmatprep.mubr.msk.f32.mxu0 %vm194_vm0, %v195_v4 }
   0x2   :  { %v167_v5 = vpack.c.bf16 %v16_v2, %v15_v1  ;;  %v18_v6 = vld [vmem:[%s273_s1 + $0x18] sm:$0xff]  ;;  %v19_v8 = vld [vmem:[%s273_s1 + $0x20] sm:$0xff]  ;;  %v20_v9 = vld [vmem:[%s273_s1 + $0x28] sm:$0xff] }
   0x3   :  { %v170_v7 = vpack.c.bf16 %v18_v6, %v17_v3  ;;  %v173_v10 = vpack.c.bf16 %v20_v9, %v19_v8  ;;  %v21_v11 = vld [vmem:[%s273_s1 + $0x30] sm:$0xff]  ;;  %v22_v12 = vld [vmem:[%s273_s1 + $0x38] sm:$0xff]  ;;  %v23_v14 = vld [vmem:[%s273_s1 + $0x40] sm:$0xff] }
   0x4   :  { %168 = vmatpush3.bf16.msra.mxu0 %v167_v5  ;;  %v176_v13 = vpack.c.bf16 %v22_v12, %v21_v11  ;;  %v24_v15 = vld [vmem:[%s273_s1 + $0x48] sm:$0xff]  ;;  %v25_v17 = vld [vmem:[%s273_s1 + $0x50] sm:$0xff]  ;;  %v26_v18 = vld [vmem:[%s273_s1 + $0x58] sm:$0xff] }
   0x5   :  { %169 = vmatprep.subr.bf16.mxu0 %v193_v0  ;;  %v179_v16 = vpack.c.bf16 %v24_v15, %v23_v14  ;;  %v182_v19 = vpack.c.bf16 %v26_v18, %v25_v17  ;;  %v27_v20 = vld [vmem:[%s273_s1 + $0x60] sm:$0xff]  ;;  %v28_v21 = vld [vmem:[%s273_s1 + $0x68] sm:$0xff]  ;;  %v29_v23 = vld [vmem:[%s273_s1 + $0x70] sm:$0xff] }
   0x6   :  { %v185_v22 = vpack.c.bf16 %v28_v21, %v27_v20  ;;  %v30_v24 = vld [vmem:[%s273_s1 + $0x78] sm:$0xff]  ;;  %v14_v26 = vld [vmem:[%s274_s0] sm:$0xff] }
   0x7   :  { %v188_v25 = vpack.c.bf16 %v30_v24, %v29_v23  ;;  %v113_v27 = vld [vmem:[%s275_s2] ss:$0 sm:$0xff] }
   0x8   :  { %171 = vmatpush3.bf16.msra.mxu0 %v170_v7 }
   0x9   :  { %172 = vmatprep.subr.bf16.mxu0 %v193_v0 }
   0xc   :  { %174 = vmatpush3.bf16.msra.mxu0 %v173_v10 }
   0xd   :  { %175 = vmatprep.subr.bf16.mxu0 %v193_v0 }
  0x10   :  { %177 = vmatpush3.bf16.msra.mxu0 %v176_v13 }
  0x11   :  { %178 = vmatprep.subr.bf16.mxu0 %v193_v0 }
  0x14   :  { %180 = vmatpush3.bf16.msra.mxu0 %v179_v16 }
  0x15   :  { %181 = vmatprep.subr.bf16.mxu0 %v193_v0 }
  0x18   :  { %183 = vmatpush3.bf16.msra.mxu0 %v182_v19 }
  0x19   :  { %184 = vmatprep.subr.bf16.mxu0 %v193_v0 }
  0x1c   :  { %186 = vmatpush3.bf16.msra.mxu0 %v185_v22 }
  0x1d   :  { %187 = vmatprep.subr.bf16.mxu0 %v193_v0 }
  0x20   :  { %189 = vmatpush3.bf16.msra.mxu0 %v188_v25 }
  0x23   :  { %164 = vmatmul.mubr.f32.vlgmr.msra.gmra.mrb[0].mxu0 %v14_v26 }
  0xf6   :  { %v104_v28 = vpop.f32.mrb[0].mxu0 }
  0xf7   :  { %v105_v29 = vadd.f32 %v113_v27, %v104_v28  ;;  %v165_v30 = vpop.f32.mrb[1].mxu0 }
  0xf9   :  { %108 = vst [vmem:[%s276_s3] sm:$0xff] %v105_v29 }

</bundles_post_ra>
